<compile_context>
chip_gen: v6e
topology: v6e:2x2x1
jax: 0.10.0
libtpu: 0.0.40
codegen_flags: <defaults>
</compile_context>

<pallas_src>
import functools

import jax
import jax.numpy as jnp
from jax.experimental import pallas as pl
from jax.experimental.pallas import tpu as pltpu

EPS = 1e-5
MOMENTUM = 0.9          # new = MOMENTUM * old + (1 - MOMENTUM) * batch (matches the spec)
_MIB = 1024 * 1024


def _phys_vmem_bytes():
    try:
        info = pltpu.get_tpu_info()
        v = int(getattr(info, "vmem_capacity_bytes", 0) or 0)
        if v > 0:
            return v
    except Exception:
        pass
    return 128 * _MIB


_PHYS_VMEM = _phys_vmem_bytes()
if _PHYS_VMEM >= 128 * _MIB:            # v5e / v6e: 128 MiB physical VMEM
    _STATS_TILE_BYTES = 16 * _MIB       # stats double-buffers x only      -> ~32 MiB
    _NORM_TILE_BYTES = 8 * _MIB         # normalize double-buffers x and y -> ~32 MiB
    _BASE_VMEM_LIMIT = 64 * _MIB
else:                                   # v7x: 64 MiB physical per TensorCore
    _STATS_TILE_BYTES = 8 * _MIB
    _NORM_TILE_BYTES = 6 * _MIB
    _BASE_VMEM_LIMIT = 48 * _MIB
_VMEM_CEIL = (_PHYS_VMEM * 3) // 4


def _pick_tile(total, max_elems, multiple):
    """Largest divisor of `total` that is a multiple of `multiple` and <= max_elems.

    Always returns a divisor of `total` (grid extents stay exact).  If no
    multiple-of-`multiple` divisor exists it returns the full extent (legal as
    a full-dim block); if none fits the cap it returns the smallest legal one.
    """
    if total <= multiple:
        return total
    if total % multiple != 0:
        return total                    # full extent; caller sizes VMEM limit from it
    cap = max(multiple, (max_elems // multiple) * multiple)
    best = None
    d = multiple
    while d <= cap:
        if total % d == 0:
            best = d
        d += multiple
    if best is not None:
        return best
    d = multiple
    while d <= total:                   # smallest legal tile (cap unreachable)
        if total % d == 0:
            return d
        d += multiple
    return total


def _vmem_limit(*single_buffer_block_bytes):
    """VMEM limit derived from the actually chosen blocks (double-buffered)."""
    need = 2 * sum(single_buffer_block_bytes) + 2 * _MIB
    return int(min(max(need, _BASE_VMEM_LIMIT), _VMEM_CEIL))


# ----------------------------------------------------------------------------
# Kernels.
# ----------------------------------------------------------------------------
def _partial_stats_kernel(x_ref, sum_ref, sq_ref, *, axes):
    """Per-tile partial sum / sum-of-squares (f32).  Each grid step owns its
    own output block, so the whole grid is 'parallel' (multi-TC friendly)."""
    x = x_ref[...].astype(jnp.float32)
    sum_ref[...] = jnp.sum(x, axis=axes, keepdims=True).reshape(sum_ref.shape)
    sq_ref[...] = jnp.sum(x * x, axis=axes, keepdims=True).reshape(sq_ref.shape)


def _normalize_kernel(x_ref, scale_ref, shift_ref, y_ref):
    """y = x * scale + shift (per-channel scale/shift precomputed outside)."""
    x = x_ref[...]
    cdt = jnp.bfloat16 if x.dtype == jnp.bfloat16 else jnp.float32
    y = x.astype(cdt) * scale_ref[...].astype(cdt) + shift_ref[...].astype(cdt)
    y_ref[...] = y.astype(y_ref.dtype)


# ----------------------------------------------------------------------------
# Layout plans.  Each plan carries the grid/BlockSpecs for the stats and the
# normalize pass plus two tiny host-side helpers:
#   fold(partials)  -> (C,)  per-channel totals from the partial-sum array
#   expand(vec_C)   -> array shaped/ordered for the scale/shift BlockSpec
# ----------------------------------------------------------------------------
def _plan_conv_std(N, C, HW, itemsize):
    # x view: (N, C, HW)  -- C on sublanes, HW (multiple of 128 or full) on lanes.
    t_s = _pick_tile(HW, max(1, _STATS_TILE_BYTES // (C * itemsize)), 128)
    t_n = _pick_tile(HW, max(1, _NORM_TILE_BYTES // (C * itemsize)), 128)
    # TODO(synk): extremely large C (block C*128*4B > VMEM limit) would need a C grid axis.
    stats = dict(
        grid=(N, HW // t_s),
        x_spec=pl.BlockSpec((1, C, t_s), lambda n, t: (n, 0, t)),
        out_shape=jax.ShapeDtypeStruct((N, HW // t_s, C, 1), jnp.float32),
        out_spec=pl.BlockSpec((1, 1, C, 1), lambda n, t: (n, t, 0, 0)),
        axes=(2,),
        x_block_bytes=C * t_s * itemsize,
        fold=lambda p: jnp.sum(p, axis=(0, 1)).reshape(C),
    )
    norm = dict(
        grid=(N, HW // t_n),
        x_spec=pl.BlockSpec((1, C, t_n), lambda n, t: (n, 0, t)),
        ss_spec=pl.BlockSpec((1, C, 1), lambda n, t: (0, 0, 0)),
        x_block_bytes=C * t_n * itemsize,
        expand=lambda v: v.reshape(1, C, 1),
    )
    return stats, norm


def _plan_conv_dense(N, C, HW, itemsize):
    # Small-C fix: view (N, C, HW) as (N, C*HW/128, 128) so both sublanes and
    # lanes are dense even when C < 8.  Per-tile we keep per-row sums; the
    # epilogue folds rows -> channels.
    R = HW // 128
    rows = C * R
    t_s = _pick_tile(rows, max(1, _STATS_TILE_BYTES // (128 * itemsize)), 8)
    t_n = _pick_tile(rows, max(1, _NORM_TILE_BYTES // (128 * itemsize)), 8)
    stats = dict(
        grid=(N, rows // t_s),
        x_spec=pl.BlockSpec((1, t_s, 128), lambda n, t: (n, t, 0)),
        out_shape=jax.ShapeDtypeStruct((N, rows, 1), jnp.float32),
        out_spec=pl.BlockSpec((1, t_s, 1), lambda n, t: (n, t, 0)),
        axes=(2,),
        x_block_bytes=t_s * 128 * itemsize,
        fold=lambda p: jnp.sum(p.reshape(N, C, R), axis=(0, 2)),
    )
    norm = dict(
        grid=(N, rows // t_n),
        x_spec=pl.BlockSpec((1, t_n, 128), lambda n, t: (n, t, 0)),
        ss_spec=pl.BlockSpec((1, t_n, 1), lambda n, t: (0, t, 0)),
        x_block_bytes=t_n * 128 * itemsize,
        expand=lambda v: jnp.repeat(v, R).reshape(1, rows, 1),
    )
    return stats, norm


def _plan_fc_flat(M, C, itemsize):
    # Small-C fix for FC: view (M, C) as (M*C/128, 128): fully dense lanes and
    # unmasked 128-wide stores; scale/shift are lane-tiled C-vectors.
    rows = (M * C) // 128
    rep = 128 // C
    t_s = _pick_tile(rows, max(1, _STATS_TILE_BYTES // (128 * itemsize)), 8)
    t_n = _pick_tile(rows, max(1, _NORM_TILE_BYTES // (128 * itemsize)), 8)
    stats = dict(
        grid=(rows // t_s,),
        x_spec=pl.BlockSpec((t_s, 128), lambda i: (i, 0)),
        out_shape=jax.ShapeDtypeStruct((rows // t_s, 1, 128), jnp.float32),
        out_spec=pl.BlockSpec((1, 1, 128), lambda i: (i, 0, 0)),
        axes=(0,),
        x_block_bytes=t_s * 128 * itemsize,
        fold=lambda p: jnp.sum(p, axis=(0, 1)).reshape(rep, C).sum(axis=0),
    )
    norm = dict(
        grid=(rows // t_n,),
        x_spec=pl.BlockSpec((t_n, 128), lambda i: (i, 0)),
        ss_spec=pl.BlockSpec((1, 128), lambda i: (0, 0)),
        x_block_bytes=t_n * 128 * itemsize,
        expand=lambda v: jnp.tile(v, rep).reshape(1, 128),
    )
    return stats, norm


def _plan_fc_std(M, C, itemsize):
    # Fallback FC layout: (M, C), reduce over sublanes.
    t_s = _pick_tile(M, max(1, _STATS_TILE_BYTES // (C * itemsize)), 8)
    t_n = _pick_tile(M, max(1, _NORM_TILE_BYTES // (C * itemsize)), 8)
    stats = dict(
        grid=(M // t_s,),
        x_spec=pl.BlockSpec((t_s, C), lambda i: (i, 0)),
        out_shape=jax.ShapeDtypeStruct((M // t_s, 1, C), jnp.float32),
        out_spec=pl.BlockSpec((1, 1, C), lambda i: (i, 0, 0)),
        axes=(0,),
        x_block_bytes=t_s * C * itemsize,
        fold=lambda p: jnp.sum(p, axis=(0, 1)).reshape(C),
    )
    norm = dict(
        grid=(M // t_n,),
        x_spec=pl.BlockSpec((t_n, C), lambda i: (i, 0)),
        ss_spec=pl.BlockSpec((1, C), lambda i: (0, 0)),
        x_block_bytes=t_n * C * itemsize,
        expand=lambda v: v.reshape(1, C),
    )
    return stats, norm


# ----------------------------------------------------------------------------
# pallas_call wrappers.
# ----------------------------------------------------------------------------
def _stats_call(x, plan):
    kern = functools.partial(_partial_stats_kernel, axes=plan["axes"])
    sems = ("parallel",) * len(plan["grid"])
    sum_p, sq_p = pl.pallas_call(
        kern,
        out_shape=(plan["out_shape"], plan["out_shape"]),
        grid=plan["grid"],
        in_specs=[plan["x_spec"]],
        out_specs=(plan["out_spec"], plan["out_spec"]),
        compiler_params=pltpu.CompilerParams(
            dimension_semantics=sems,
            vmem_limit_bytes=_vmem_limit(plan["x_block_bytes"])),
    )(x)
    return plan["fold"](sum_p), plan["fold"](sq_p)


def _normalize_call(x, scale, shift, plan):
    sems = ("parallel",) * len(plan["grid"])
    return pl.pallas_call(
        _normalize_kernel,
        out_shape=jax.ShapeDtypeStruct(x.shape, x.dtype),
        grid=plan["grid"],
        in_specs=[plan["x_spec"], plan["ss_spec"], plan["ss_spec"]],
        out_specs=plan["x_spec"],
        compiler_params=pltpu.CompilerParams(
            dimension_semantics=sems,
            vmem_limit_bytes=_vmem_limit(2 * plan["x_block_bytes"])),
    )(x, scale, shift)


# ----------------------------------------------------------------------------
# Module.
# ----------------------------------------------------------------------------
class BatchNorm:
    """JAX/Pallas port of the scratch BatchNorm module (training-mode forward)."""

    def __init__(self, num_features, num_dims):
        if num_dims == 2:
            shape = (1, num_features)
        else:
            shape = (1, num_features, 1, 1)
        self.shape = shape
        self.num_features = num_features
        self.gamma = jnp.ones(shape, jnp.float32)
        self.beta = jnp.zeros(shape, jnp.float32)
        self.moving_mean = jnp.zeros(shape, jnp.float32)
        self.moving_var = jnp.ones(shape, jnp.float32)

    def __call__(self, X, training=True):
        C = self.num_features
        itemsize = jnp.dtype(X.dtype).itemsize

        if X.ndim == 4:
            N, Cx, H, W = X.shape
            assert Cx == C
            HW = H * W
            total = N * HW
            if C < 8 and HW % 128 == 0:
                x = X.reshape(N, (C * HW) // 128, 128)
                stats_plan, norm_plan = _plan_conv_dense(N, C, HW, itemsize)
            else:
                x = X.reshape(N, C, HW)
                stats_plan, norm_plan = _plan_conv_std(N, C, HW, itemsize)
        elif X.ndim == 2:
            M, Cx = X.shape
            assert Cx == C
            total = M
            if C <= 128 and 128 % C == 0 and (M * C) % 128 == 0:
                x = X.reshape((M * C) // 128, 128)
                stats_plan, norm_plan = _plan_fc_flat(M, C, itemsize)
            else:
                x = X
                stats_plan, norm_plan = _plan_fc_std(M, C, itemsize)
        else:
            raise ValueError("Only 2D (FC) or 4D (CONV) inputs are supported.")

        gamma = self.gamma.reshape(C).astype(jnp.float32)
        beta = self.beta.reshape(C).astype(jnp.float32)

        if training:
            sum_c, sq_c = _stats_call(x, stats_plan)
            mean = sum_c / total
            # TODO(synk): E[x^2]-mean^2 in f32 can cancel for |mean| >> std; a
            # two-level/Welford pass would fix it at extra cost.
            var = jnp.maximum(sq_c / total - mean * mean, 0.0)   # biased (spec semantics)
            self.moving_mean = (MOMENTUM * self.moving_mean
                                + (1.0 - MOMENTUM) * mean.reshape(self.shape))
            self.moving_var = (MOMENTUM * self.moving_var
                               + (1.0 - MOMENTUM) * var.reshape(self.shape))
        else:
            mean = self.moving_mean.reshape(C)
            var = self.moving_var.reshape(C)

        # Tiny epilogue: per-channel scale/shift so the kernel is a single FMA.
        scale = gamma / jnp.sqrt(var + EPS)
        shift = beta - mean * scale
        scale_b = norm_plan["expand"](scale)
        shift_b = norm_plan["expand"](shift)

        y = _normalize_call(x, scale_b, shift_b, norm_plan)
        return y.reshape(X.shape)


if __name__ == "__main__":
    key = jax.random.PRNGKey(0)
    k1, k2 = jax.random.split(key)

    # ----- 4D (CONV) case: N=2, C=4, H=W=16 -----
    N, C, H, W = 2, 4, 16, 16
    X = jax.random.normal(k1, (N, C, H, W), dtype=jnp.float32) * 2.0 + 0.5
    bn = BatchNorm(num_features=C, num_dims=4)
    g0, b0, mm0, mv0 = bn.gamma, bn.beta, bn.moving_mean, bn.moving_var
    Y = bn(X)
    jax.block_until_ready(Y)
    jax.block_until_ready(bn.moving_mean)
    jax.block_until_ready(bn.moving_var)

    mean = jnp.mean(X, axis=(0, 2, 3), keepdims=True)
    var = jnp.mean((X - mean) ** 2, axis=(0, 2, 3), keepdims=True)
    Y_ref = (X - mean) / jnp.sqrt(var + EPS) * g0 + b0
    mm_ref = MOMENTUM * mm0 + (1.0 - MOMENTUM) * mean
    mv_ref = MOMENTUM * mv0 + (1.0 - MOMENTUM) * var
    assert jnp.allclose(Y, Y_ref, atol=1e-4, rtol=1e-4)
    assert jnp.allclose(bn.moving_mean, mm_ref, atol=1e-5, rtol=1e-4)
    assert jnp.allclose(bn.moving_var, mv_ref, atol=1e-5, rtol=1e-4)

    # ----- 2D (FC) case: batch=8, hidden=32 -----
    M, F = 8, 32
    X2 = jax.random.normal(k2, (M, F), dtype=jnp.float32) * 1.5 - 0.25
    bn2 = BatchNorm(num_features=F, num_dims=2)
    g2, b2, mm2, mv2 = bn2.gamma, bn2.beta, bn2.moving_mean, bn2.moving_var
    Y2 = bn2(X2)
    jax.block_until_ready(Y2)
    jax.block_until_ready(bn2.moving_mean)
    jax.block_until_ready(bn2.moving_var)

    mean2 = jnp.mean(X2, axis=0, keepdims=True)
    var2 = jnp.mean((X2 - mean2) ** 2, axis=0, keepdims=True)
    Y2_ref = (X2 - mean2) / jnp.sqrt(var2 + EPS) * g2 + b2
    mm2_ref = MOMENTUM * mm2 + (1.0 - MOMENTUM) * mean2
    mv2_ref = MOMENTUM * mv2 + (1.0 - MOMENTUM) * var2
    assert jnp.allclose(Y2, Y2_ref, atol=1e-4, rtol=1e-4)
    assert jnp.allclose(bn2.moving_mean, mm2_ref, atol=1e-5, rtol=1e-4)
    assert jnp.allclose(bn2.moving_var, mv2_ref, atol=1e-5, rtol=1e-4)

    print("KERNEL_OK")
</pallas_src>

<mosaic_0001>
module attributes {stable_mosaic.version = 11 : i64} {
  func.func @_partial_stats_kernel(%arg0: i32, %arg1: i32, %arg2: memref<1x8x128xf32, #tpu.memory_space<vmem>>, %arg3: memref<1x8x1xf32, #tpu.memory_space<vmem>>, %arg4: memref<1x8x1xf32, #tpu.memory_space<vmem>>) attributes {dimension_semantics = [#tpu.dimension_semantics<parallel>, #tpu.dimension_semantics<parallel>], iteration_bounds = array<i64: 2, 1>, scalar_prefetch = 0 : i64, scratch_operands = 0 : i64, tpu.core_type = #tpu.core_type<tc>, window_params = [{transform_indices = @transform_0, window_bounds = array<i64: 1, 8, 128>}, {transform_indices = @transform_1, window_bounds = array<i64: 1, 8, 1>}, {transform_indices = @transform_2, window_bounds = array<i64: 1, 8, 1>}]} {
    %c0 = arith.constant 0 : index
    %c0_0 = arith.constant 0 : index
    %c0_1 = arith.constant 0 : index
    %0 = vector.load %arg2[%c0, %c0_0, %c0_1] : memref<1x8x128xf32, #tpu.memory_space<vmem>>, vector<1x8x128xf32>
    %cst = arith.constant dense<0.000000e+00> : vector<1x8xf32>
    %1 = vector.multi_reduction <add>, %0, %cst [2] : vector<1x8x128xf32> to vector<1x8xf32>
    %2 = vector.shape_cast %1 : vector<1x8xf32> to vector<1x8x1xf32>
    %c0_2 = arith.constant 0 : index
    %c0_3 = arith.constant 0 : index
    %c0_4 = arith.constant 0 : index
    %3 = vector.load %arg3[%c0_2, %c0_3, %c0_4] : memref<1x8x1xf32, #tpu.memory_space<vmem>>, vector<1x8x1xf32>
    tpu.vector_store %arg3[%c0_2, %c0_3, %c0_4], %2 {strides = array<i32>} : memref<1x8x1xf32, #tpu.memory_space<vmem>>, vector<1x8x1xf32>,
    %4 = arith.mulf %0, %0 : vector<1x8x128xf32>
    %cst_5 = arith.constant dense<0.000000e+00> : vector<1x8xf32>
    %5 = vector.multi_reduction <add>, %4, %cst_5 [2] : vector<1x8x128xf32> to vector<1x8xf32>
    %6 = vector.shape_cast %5 : vector<1x8xf32> to vector<1x8x1xf32>
    %c0_6 = arith.constant 0 : index
    %c0_7 = arith.constant 0 : index
    %c0_8 = arith.constant 0 : index
    %7 = vector.load %arg4[%c0_6, %c0_7, %c0_8] : memref<1x8x1xf32, #tpu.memory_space<vmem>>, vector<1x8x1xf32>
    tpu.vector_store %arg4[%c0_6, %c0_7, %c0_8], %6 {strides = array<i32>} : memref<1x8x1xf32, #tpu.memory_space<vmem>>, vector<1x8x1xf32>,
    return
  }
  func.func @transform_0(%arg0: i32, %arg1: i32) -> (i32, i32, i32) {
    %c0_i32 = arith.constant 0 : i32
    %c0_i32_0 = arith.constant 0 : i32
    return %arg0, %arg1, %c0_i32 : i32, i32, i32
  }
  func.func @transform_1(%arg0: i32, %arg1: i32) -> (i32, i32, i32) {
    %c0_i32 = arith.constant 0 : i32
    %c0_i32_0 = arith.constant 0 : i32
    return %arg0, %arg1, %c0_i32 : i32, i32, i32
  }
  func.func @transform_2(%arg0: i32, %arg1: i32) -> (i32, i32, i32) {
    %c0_i32 = arith.constant 0 : i32
    %c0_i32_0 = arith.constant 0 : i32
    return %arg0, %arg1, %c0_i32 : i32, i32, i32
  }
}

</mosaic_0001>

<bundles_post_ra>
// kernel: tpu_custom_call.1
= control target key start
LH: loop header
LB: loop body
LE: loop exit
PB: predicated region body
PF: predicated region fallthrough
CT: control target
= control target key end

     0   :  { %8 = vsyncpa [#allocation3], 0  ;;  %s601_s0 = inlined_call_operand.hbm [shape: f32[2,8,128], index: 0, kind: input, shape index: {}]   ;;  %s602_s1 = inlined_call_operand.vmem [shape: f32[2,8,1], index: 1, kind: output, shape index: {0}]   ;;  %s603_s2 = inlined_call_operand.vmem [shape: f32[2,8,1], index: 2, kind: output, shape index: {1}]  }
   0x1   :  { %10 = vsyncpa [#allocation3 + $0x1], 0  ;;  %s498_s9 = smov 0   ;;  %s500_s10 = smov 0  }
   0x2   :  { %s502_s11 = smov 0   ;;  %s504_s12 = smov 0  }
   0x3   :  { %s506_s13 = smov 0   ;;  %s508_s14 = smov 0  }
   0x4 LB: > { %s335_s15 = sadd.s32 4294967295, %s480_s14   ;;  %s28_s16 = sadd.s32 1, %s476_s13  ;;  %s480_s14 = sphi %s508_s14, %s16_s14   ;;  %s476_s13 = sphi %s506_s13, %s611_s13   ;;  %s472_s12 = sphi %s504_s12, %s610_s12   ;;  %s468_s11 = sphi %s502_s11, %s609_s11   ;;  %s464_s10 = sphi %s500_s10, %s608_s10   ;;  %s460_s9 = sphi %s498_s9, %s607_s9  }
   0x5   : > { %p30_p0 = scmp.ge.s32.totalorder %s28_s16, 2  ;;  %s37_s17 = sadd.s32 1, %s468_s11 }
   0x6   : > { %p44_p1 = scmp.ne.s32.totalorder %s468_s11, %s464_s10  ;;  %p45_p2 = scmp.eq.s32.totalorder %s480_s14, 0 }
   0x7   : > { %s613_s16 = smov (%p30_p0, %s28_s16), 0  ;;  %p50_p4 = scmp.ne.s32.totalorder %s464_s10, %s460_s9 }
   0x8   : > { %p534_p3 = por %p45_p2, %p44_p1  ;;  %s32_s19 = ssub.s32 %s476_s13, %s613_s16 }
   0x9   : > { %p51_p5 = scmp.eq.s32.totalorder %s335_s15, 0  ;;  %p35_p6 = scmp.eq.s32.totalorder %s32_s19, 0 }
   0xa   : > { %p353_p8 = scmp.lt.s32.totalorder %s480_s14, 2  ;;  %s130_s22 = sand.u32 1, %s468_s11  }
   0xb   : > { %p541_p7 = por %p51_p5, %p50_p4  ;;  %s340_s23 = sshll.u32 %s476_s13, 7 }
   0xc   : > { %s547_s21 = scalar_select %p35_p6, %s468_s11, %s37_s17  }
   0xd   : > { %s339_s24 = sshll.u32 %s130_s22, 3  ;;  %s140_s27 = scalar_lea.hbm %s601_s0, %s340_s23 }
   0xe   : > { %s134_s28 = scalar_lea.vmem [#allocation2], %s339_s24  ;;  %p556_p9 = pnand %p353_p8, %p534_p3 }
   0xf   : > { %s142_s29 = sshll.u32 %s134_s28, 4  ;;  %p341_p10 = scmp.ge.s32.totalorder %s480_s14, 1  ;;  %s143_s29 = int_to_ptr.vmem [resolvable:$true] %s142_s29 }
  0x10   : > { %p147_p11 = scmp.lt.s32.totalorder %s480_s14, 3  ;;  %s131_s3 = scalar_lea.sflag [#allocation3], %s130_s22 }
  0x11   : > { %p404_p12 = pneg %p556_p9  ;;  %s415_s4 = scalar_lea.vmem %s143_s29, 128 }
  0x12   : > { %p416_p13 = scmp.ne.s32.totalorder %s143_s29, %s415_s4  ;;  %s482_s5 = smov [#allocation2]  }
  0x13   : > { %s420_s6 = sshll.u32 %s482_s5, 4  ;;  %s421_s6 = int_to_ptr.vmem [resolvable:$false] %s420_s6 }
  0x14   : > { %p418_p0 = pnand %p416_p13, %p404_p12  ;;  %s422_s7 = scalar_lea.vmem %s421_s6, 256 }
  0x15   : > { %p423_p2 = scmp.lt.s32.totalorder %s143_s29, %s421_s6  ;;  %p424_p3 = scmp.lt.s32.totalorder %s422_s7, %s415_s4 }
  0x16   : > { %p419_p1 = pneg %p418_p0 }
  0x17   : > { %p425_p4 = por %p424_p3, %p423_p2 }
  0x19   : > { %p426_p5 = pnand %p425_p4, %p419_p1 }
  0x1b   : > { %429 = shalt.err (!%p426_p5)
}
  0x1c   : > { %352 = dma.hbm_to_vmem [thread:$0]  (!%p556_p9), %s140_s27, 128, %s143_s29, %s131_s3  }
  0x1d   : > { %p148_p6 = pnand %p341_p10, %p147_p11 }
  0x1e   : > { %s153_s8 = sand.u32 (!%p148_p6), 1, %s464_s10  }
  0x1f   : > { %151 = sbr.rel (%p148_p6) target bundleno = 181 (0xb5), region = 24  ;;  %s342_s9 = sshll.u32 (!%p148_p6), %s153_s8, 3 }
  0x20   : > { %s154_s15 = scalar_lea.sflag (!%p148_p6), [#allocation3], %s153_s8  ;;  %s157_s17 = scalar_lea.vmem (!%p148_p6), [#allocation2], %s342_s9 }
  0x24   : > { %455 = dma.done.wait (%p541_p7), %s154_s15, 128  }
  0x25   : > { %457 = vsyncadd (%p541_p7), %s154_s15, 4294967168  ;;  %v201_v0 = vld [vmem:[%s157_s17] sm:$0xff]  ;;  %p187_p8 = scmp.lt.s32.totalorder %s472_s12, 1  ;;  %vm204_vm0 = vcmask 7168  }
  0x26   : > { %202 = vadd.xlane.f32.xlu0 %v201_v0  ;;  %v206_v1 = vmul.f32 %v201_v0, %v201_v0 }
  0x27   : > { %s615_s12 = smov (!%p187_p8, %s472_s12), 1 }
  0x28   : > { %s343_s18 = sshll.u32 %s615_s12, 3 }
  0x29   : > { %s193_s23 = scalar_lea.vmem %s602_s1, %s343_s18  ;;  %s200_s20 = scalar_lea.vmem %s603_s2, %s343_s18 }
  0x2a   : > { %207 = vadd.xlane.f32.xlu0 %v206_v1 }
  0xaf   : > { %v203_v2 = vpop.xlane.xlu0 %202 }
  0xb0   : > { %205 = vst.msk [vmem:[%s193_s23] sm:$0xff] %vm204_vm0, %v203_v2 }
  0xb3   : > { %v208_v3 = vpop.xlane.xlu0 %207 }
  0xb4   : > { %209 = vst.msk [vmem:[%s200_s20] sm:$0xff] %vm204_vm0, %v208_v3 }
  0xb5 PF: > { %s16_s14 = sadd.s32 1, %s480_s14   ;;  %s607_s9 = smov %s464_s10 }
  0xb6   : > { %p13_p7 = scmp.ge.s32.totalorder %s16_s14, 4   ;;  %s608_s10 = smov %s468_s11 }
  0xb7   : > { %s609_s11 = smov %s547_s21  ;;  %s610_s12 = smov %s476_s13 }
  0xb8   : > { %s611_s13 = smov %s613_s16  ;;  %15 = sbr.rel (!%p13_p7) target bundleno = 4 (0x4), region = 76 }
  0xbd   :  { %255 = vsyncpa [#allocation3], 1 }
  0xbe   :  { %257 = vsyncpa [#allocation3 + $0x1], 1 }

</bundles_post_ra>
